<compile_context>
chip_gen: v7x
topology: tpu7x:2x2x1
jax: 0.10.0
libtpu: 0.0.40
codegen_flags: <defaults>
</compile_context>

<pallas_src>
import functools

import jax
import jax.numpy as jnp
from jax.experimental import pallas as pl
from jax.experimental.pallas import tpu as pltpu


# ----------------------------- Pallas kernel ------------------------------ #
def _reproject_depth_kernel(params_ref, slab_ref, out_ref):
    # params_ref: SMEM (16,) f32 = [R_cw(9, row-major), t(3), fx, fy, cx, cy]
    R00 = params_ref[0]
    R01 = params_ref[1]
    R02 = params_ref[2]
    R10 = params_ref[3]
    R11 = params_ref[4]
    R12 = params_ref[5]
    R20 = params_ref[6]
    R21 = params_ref[7]
    R22 = params_ref[8]
    tx = params_ref[9]
    ty = params_ref[10]
    tz = params_ref[11]
    fx = params_ref[12]
    fy = params_ref[13]
    cx = params_ref[14]
    cy = params_ref[15]

    # packed slab rows: [x_w, y_w, z_w, u_obs, v_obs, d_obs, pad, pad]
    dx = slab_ref[0:1, :] - tx
    dy = slab_ref[1:2, :] - ty
    dz = slab_ref[2:3, :] - tz
    u_obs = slab_ref[3:4, :]
    v_obs = slab_ref[4:5, :]
    d_obs = slab_ref[5:6, :]

    # p_c = R_cw @ (p_w - t)   (SE3.Inv().Act) -- 9 scalar-broadcast VPU FMAs
    xc = R00 * dx + R01 * dy + R02 * dz
    yc = R10 * dx + R11 * dy + R12 * dz
    zc = R20 * dx + R21 * dy + R22 * dz

    # point2pixel_NED: camera x = forward (depth), y = right, z = down
    inv_x = 1.0 / xc  # exact divide (kernel is HBM-bound; approx not worth it)
    u = fx * yc * inv_x + cx
    v = fy * zc * inv_x + cy

    # single full-block store: rows = [u_err, v_err, depth_err]
    out_ref[...] = jnp.concatenate([u - u_obs, v - v_obs, xc - d_obs], axis=0)


# ------------------------------ JAX wrapper -------------------------------- #
def _quat_to_rotmat(q):
    """q = [qx, qy, qz, qw] (pypose convention). Returns R_wc s.t. p_w = R p_c + t."""
    x, y, z, w = q[0], q[1], q[2], q[3]
    xx, yy, zz = x * x, y * y, z * z
    xy, xz, yz = x * y, x * z, y * z
    wx, wy, wz = w * x, w * y, w * z
    return jnp.array(
        [
            [1.0 - 2.0 * (yy + zz), 2.0 * (xy - wz), 2.0 * (xz + wy)],
            [2.0 * (xy + wz), 1.0 - 2.0 * (xx + zz), 2.0 * (yz - wx)],
            [2.0 * (xz - wy), 2.0 * (yz + wx), 1.0 - 2.0 * (xx + yy)],
        ],
        dtype=jnp.float32,
    )


@functools.partial(jax.jit, static_argnames=("max_tile_n",))
def pose_graph_depth_forward(pose, pos_Tw, kp2, kp2_depth, K, max_tile_n=8192):
    """Replicates PoseGraph_withDepthConstraint.forward().

    pose      : (7,)   SE3 [tx, ty, tz, qx, qy, qz, qw]  (T_wc: camera-to-world)
    pos_Tw    : (N, 3) world points
    kp2       : (N, 2) observed pixels in frame 2
    kp2_depth : (N, 1) observed depths in frame 2
    K         : (3, 3) intrinsics
    returns   : (N, 3) [reproj_err_u, reproj_err_v, depth_err]
    """
    N = pos_Tw.shape[0]
    t = pose[:3].astype(jnp.float32)
    q = pose[3:7].astype(jnp.float32)
    R_cw = _quat_to_rotmat(q).T  # inverse rotation

    params = jnp.concatenate(
        [
            R_cw.reshape(-1),
            t,
            jnp.array([K[0, 0], K[1, 1], K[0, 2], K[1, 2]], dtype=jnp.float32),
        ]
    ).astype(jnp.float32)  # (16,)

    # Block sizing: big lane-wide blocks (mem-bound kernel; tiny tiles are
    # dominated by per-grid-step overhead), but keep >= 2 grid steps so both
    # TensorCores of a v7x chip get work.  Each input block is 8*blk*4 B << VMEM.
    half = (N + 1) // 2
    blk = min(max_tile_n, ((half + 127) // 128) * 128)
    blk = max(blk, 128)
    n_pad = max(((N + blk - 1) // blk) * blk, 2 * blk)
    grid = (n_pad // blk,)

    # One 8-sublane-aligned slab; pad lanes with 1.0 (keeps padded x away from 0;
    # padded lanes are sliced off before return anyway).
    data = jnp.concatenate(
        [
            pos_Tw.astype(jnp.float32),
            kp2.astype(jnp.float32),
            kp2_depth.reshape(N, 1).astype(jnp.float32),
        ],
        axis=-1,
    ).T  # (6, N)
    slab = jnp.pad(data, ((0, 2), (0, n_pad - N)), constant_values=1.0)  # (8, n_pad)

    out = pl.pallas_call(
        _reproject_depth_kernel,
        out_shape=jax.ShapeDtypeStruct((3, n_pad), jnp.float32),
        grid_spec=pltpu.PrefetchScalarGridSpec(
            num_scalar_prefetch=0,
            grid=grid,
            in_specs=[
                pl.BlockSpec(memory_space=pltpu.MemorySpace.SMEM),  # params
                pl.BlockSpec((8, blk), lambda i: (0, i)),           # packed slab
            ],
            out_specs=pl.BlockSpec((3, blk), lambda i: (0, i)),
        ),
        compiler_params=pltpu.CompilerParams(dimension_semantics=("parallel",)),
    )(params, slab)

    # slice padded lanes off BEFORE transposing
    return out[:, :N].T  # (N, 3)


def _reference(pose, pos_Tw, kp2, kp2_depth, K):
    t = pose[:3]
    R_wc = _quat_to_rotmat(pose[3:7])
    p_c = (pos_Tw - t[None, :]) @ R_wc  # == (R_wc.T @ (p - t).T).T
    u = K[0, 0] * p_c[:, 1] / p_c[:, 0] + K[0, 2]
    v = K[1, 1] * p_c[:, 2] / p_c[:, 0] + K[1, 2]
    reproj = jnp.stack([u, v], axis=-1) - kp2
    depth = p_c[:, 0:1] - kp2_depth.reshape(-1, 1)
    return jnp.concatenate([reproj, depth], axis=-1)


if __name__ == "__main__":
    key = jax.random.PRNGKey(0)
    k_pts, k_q, k_t, k_kp, k_d = jax.random.split(key, 5)

    N = 8  # number of point/observation pairs

    # world points in front of the camera (NED: x forward)
    pos_Tw = jnp.concatenate(
        [
            jax.random.uniform(k_pts, (N, 1), minval=4.0, maxval=10.0),
            jax.random.uniform(k_pts, (N, 2), minval=-2.0, maxval=2.0),
        ],
        axis=-1,
    ).astype(jnp.float32)

    q = jax.random.normal(k_q, (4,), dtype=jnp.float32) * 0.1 + jnp.array(
        [0.0, 0.0, 0.0, 1.0], jnp.float32
    )
    q = q / jnp.linalg.norm(q)
    t = jax.random.normal(k_t, (3,), dtype=jnp.float32) * 0.2
    pose = jnp.concatenate([t, q])  # SE3 [t, q]

    kp2 = jax.random.uniform(k_kp, (N, 2), minval=0.0, maxval=640.0).astype(jnp.float32)
    kp2_depth = jax.random.uniform(k_d, (N, 1), minval=3.0, maxval=11.0).astype(
        jnp.float32
    )

    K = jnp.array(
        [[320.0, 0.0, 320.0], [0.0, 320.0, 240.0], [0.0, 0.0, 1.0]], dtype=jnp.float32
    )

    out = pose_graph_depth_forward(pose, pos_Tw, kp2, kp2_depth, K)
    out = jax.block_until_ready(out)

    ref = _reference(pose, pos_Tw, kp2, kp2_depth, K)
    assert out.shape == (N, 3)
    assert jnp.allclose(out, ref, atol=1e-3, rtol=1e-4), (out, ref)

    # TODO(synk): covariance_array() / write_back() are outside the forward()
    # hot path and are not implemented as kernels.
    print("KERNEL_OK")
</pallas_src>

<mosaic_0001>
module attributes {stable_mosaic.version = 11 : i64} {
  func.func @_reproject_depth_kernel(%arg0: i32, %arg1: memref<16xf32, #tpu.memory_space<smem>>, %arg2: memref<8x128xf32, #tpu.memory_space<vmem>>, %arg3: memref<3x128xf32, #tpu.memory_space<vmem>>) attributes {dimension_semantics = [#tpu.dimension_semantics<parallel>], iteration_bounds = array<i64: 2>, scalar_prefetch = 0 : i64, scratch_operands = 0 : i64, tpu.core_type = #tpu.core_type<tc>, window_params = [{transform_indices = @transform_0, window_bounds = array<i64: 16>}, {transform_indices = @transform_1, window_bounds = array<i64: 8, 128>}, {transform_indices = @transform_2, window_bounds = array<i64: 3, 128>}]} {
    %c0 = arith.constant 0 : index
    %0 = memref.load %arg1[%c0] : memref<16xf32, #tpu.memory_space<smem>>
    %c1 = arith.constant 1 : index
    %1 = memref.load %arg1[%c1] : memref<16xf32, #tpu.memory_space<smem>>
    %c2 = arith.constant 2 : index
    %2 = memref.load %arg1[%c2] : memref<16xf32, #tpu.memory_space<smem>>
    %c3 = arith.constant 3 : index
    %3 = memref.load %arg1[%c3] : memref<16xf32, #tpu.memory_space<smem>>
    %c4 = arith.constant 4 : index
    %4 = memref.load %arg1[%c4] : memref<16xf32, #tpu.memory_space<smem>>
    %c5 = arith.constant 5 : index
    %5 = memref.load %arg1[%c5] : memref<16xf32, #tpu.memory_space<smem>>
    %c6 = arith.constant 6 : index
    %6 = memref.load %arg1[%c6] : memref<16xf32, #tpu.memory_space<smem>>
    %c7 = arith.constant 7 : index
    %7 = memref.load %arg1[%c7] : memref<16xf32, #tpu.memory_space<smem>>
    %c8 = arith.constant 8 : index
    %8 = memref.load %arg1[%c8] : memref<16xf32, #tpu.memory_space<smem>>
    %c9 = arith.constant 9 : index
    %9 = memref.load %arg1[%c9] : memref<16xf32, #tpu.memory_space<smem>>
    %c10 = arith.constant 10 : index
    %10 = memref.load %arg1[%c10] : memref<16xf32, #tpu.memory_space<smem>>
    %c11 = arith.constant 11 : index
    %11 = memref.load %arg1[%c11] : memref<16xf32, #tpu.memory_space<smem>>
    %c12 = arith.constant 12 : index
    %12 = memref.load %arg1[%c12] : memref<16xf32, #tpu.memory_space<smem>>
    %c13 = arith.constant 13 : index
    %13 = memref.load %arg1[%c13] : memref<16xf32, #tpu.memory_space<smem>>
    %c14 = arith.constant 14 : index
    %14 = memref.load %arg1[%c14] : memref<16xf32, #tpu.memory_space<smem>>
    %c15 = arith.constant 15 : index
    %15 = memref.load %arg1[%c15] : memref<16xf32, #tpu.memory_space<smem>>
    %c0_0 = arith.constant 0 : index
    %c0_1 = arith.constant 0 : index
    %16 = vector.load %arg2[%c0_0, %c0_1] : memref<8x128xf32, #tpu.memory_space<vmem>>, vector<1x128xf32>
    %17 = vector.broadcast %9 : f32 to vector<1x128xf32>
    %18 = arith.subf %16, %17 : vector<1x128xf32>
    %c1_2 = arith.constant 1 : index
    %c0_3 = arith.constant 0 : index
    %19 = vector.load %arg2[%c1_2, %c0_3] : memref<8x128xf32, #tpu.memory_space<vmem>>, vector<1x128xf32>
    %20 = vector.broadcast %10 : f32 to vector<1x128xf32>
    %21 = arith.subf %19, %20 : vector<1x128xf32>
    %c2_4 = arith.constant 2 : index
    %c0_5 = arith.constant 0 : index
    %22 = vector.load %arg2[%c2_4, %c0_5] : memref<8x128xf32, #tpu.memory_space<vmem>>, vector<1x128xf32>
    %23 = vector.broadcast %11 : f32 to vector<1x128xf32>
    %24 = arith.subf %22, %23 : vector<1x128xf32>
    %c3_6 = arith.constant 3 : index
    %c0_7 = arith.constant 0 : index
    %25 = vector.load %arg2[%c3_6, %c0_7] : memref<8x128xf32, #tpu.memory_space<vmem>>, vector<1x128xf32>
    %c4_8 = arith.constant 4 : index
    %c0_9 = arith.constant 0 : index
    %26 = vector.load %arg2[%c4_8, %c0_9] : memref<8x128xf32, #tpu.memory_space<vmem>>, vector<1x128xf32>
    %c5_10 = arith.constant 5 : index
    %c0_11 = arith.constant 0 : index
    %27 = vector.load %arg2[%c5_10, %c0_11] : memref<8x128xf32, #tpu.memory_space<vmem>>, vector<1x128xf32>
    %28 = vector.broadcast %0 : f32 to vector<1x128xf32>
    %29 = arith.mulf %28, %18 : vector<1x128xf32>
    %30 = vector.broadcast %1 : f32 to vector<1x128xf32>
    %31 = arith.mulf %30, %21 : vector<1x128xf32>
    %32 = arith.addf %29, %31 : vector<1x128xf32>
    %33 = vector.broadcast %2 : f32 to vector<1x128xf32>
    %34 = arith.mulf %33, %24 : vector<1x128xf32>
    %35 = arith.addf %32, %34 : vector<1x128xf32>
    %36 = vector.broadcast %3 : f32 to vector<1x128xf32>
    %37 = arith.mulf %36, %18 : vector<1x128xf32>
    %38 = vector.broadcast %4 : f32 to vector<1x128xf32>
    %39 = arith.mulf %38, %21 : vector<1x128xf32>
    %40 = arith.addf %37, %39 : vector<1x128xf32>
    %41 = vector.broadcast %5 : f32 to vector<1x128xf32>
    %42 = arith.mulf %41, %24 : vector<1x128xf32>
    %43 = arith.addf %40, %42 : vector<1x128xf32>
    %44 = vector.broadcast %6 : f32 to vector<1x128xf32>
    %45 = arith.mulf %44, %18 : vector<1x128xf32>
    %46 = vector.broadcast %7 : f32 to vector<1x128xf32>
    %47 = arith.mulf %46, %21 : vector<1x128xf32>
    %48 = arith.addf %45, %47 : vector<1x128xf32>
    %49 = vector.broadcast %8 : f32 to vector<1x128xf32>
    %50 = arith.mulf %49, %24 : vector<1x128xf32>
    %51 = arith.addf %48, %50 : vector<1x128xf32>
    %cst = arith.constant 1.000000e+00 : f32
    %52 = vector.broadcast %cst : f32 to vector<1x128xf32>
    %53 = arith.divf %52, %35 : vector<1x128xf32>
    %54 = vector.broadcast %12 : f32 to vector<1x128xf32>
    %55 = arith.mulf %54, %43 : vector<1x128xf32>
    %56 = arith.mulf %55, %53 : vector<1x128xf32>
    %57 = vector.broadcast %14 : f32 to vector<1x128xf32>
    %58 = arith.addf %56, %57 : vector<1x128xf32>
    %59 = vector.broadcast %13 : f32 to vector<1x128xf32>
    %60 = arith.mulf %59, %51 : vector<1x128xf32>
    %61 = arith.mulf %60, %53 : vector<1x128xf32>
    %62 = vector.broadcast %15 : f32 to vector<1x128xf32>
    %63 = arith.addf %61, %62 : vector<1x128xf32>
    %64 = arith.subf %58, %25 : vector<1x128xf32>
    %65 = arith.subf %63, %26 : vector<1x128xf32>
    %66 = arith.subf %35, %27 : vector<1x128xf32>
    %67 = tpu.concatenate %64, %65, %66 in 0 : vector<1x128xf32>, vector<1x128xf32>, vector<1x128xf32> -> vector<3x128xf32>
    %c0_12 = arith.constant 0 : index
    %c0_13 = arith.constant 0 : index
    %68 = vector.load %arg3[%c0_12, %c0_13] : memref<3x128xf32, #tpu.memory_space<vmem>>, vector<3x128xf32>
    tpu.vector_store %arg3[%c0_12, %c0_13], %67 {strides = array<i32>} : memref<3x128xf32, #tpu.memory_space<vmem>>, vector<3x128xf32>,
    return
  }
  func.func @transform_0(%arg0: i32) -> i32 {
    %c0_i32 = arith.constant 0 : i32
    %c0_i32_0 = arith.constant 0 : i32
    return %c0_i32 : i32
  }
  func.func @transform_1(%arg0: i32) -> (i32, i32) {
    %c0_i32 = arith.constant 0 : i32
    %c0_i32_0 = arith.constant 0 : i32
    return %c0_i32, %arg0 : i32, i32
  }
  func.func @transform_2(%arg0: i32) -> (i32, i32) {
    %c0_i32 = arith.constant 0 : i32
    %c0_i32_0 = arith.constant 0 : i32
    return %c0_i32, %arg0 : i32, i32
  }
}

</mosaic_0001>

<bundles_post_ra>
// kernel: pose_graph_depth_forward.1
= control target key start
LH: loop header
LB: loop body
LE: loop exit
PB: predicated region body
PF: predicated region fallthrough
CT: control target
= control target key end

     0   :  { %7 = vsyncpa [#allocation3], 0  ;;  %s386_s9 = smov 0   ;;  %s438_s0 = inlined_call_operand.vmem [shape: f32[16], index: 0, kind: input, shape index: {}]   ;;  %s439_s1 = inlined_call_operand.vmem [shape: f32[8,256], index: 1, kind: input, shape index: {}]   ;;  %s440_s2 = inlined_call_operand.vmem [shape: f32[3,256], index: 2, kind: output, shape index: {}]  }
   0x1 LB: > { %s296_s10 = sadd.s32 4294967295, %s368_s9   ;;  %p298_p0 = scmp.ge.s32.totalorder %s368_s9, 1  ;;  %s368_s9 = sphi %s386_s9, %s13_s9  }
   0x2   : > { %p91_p1 = scmp.lt.s32.totalorder %s368_s9, 3  ;;  %s104_s13 = sshll.u32 %s438_s0, 4  ;;  %s105_s13 = int_to_ptr.vmem [resolvable:$true] %s104_s13 }
   0x3   : > { %p330_p3 = scmp.eq.s32.totalorder %s296_s10, 0  ;;  %s343_s15 = scalar_lea.vmem %s105_s13, 16 }
   0x4   : > { %p397_p2 = pnand %p298_p0, %p91_p1  ;;  %p344_p6 = scmp.ne.s32.totalorder %s105_s13, %s343_s15 }
   0x5   : > { %p351_p10 = scmp.lt.s32.totalorder %s105_s13, %s105_s13  ;;  %p352_p11 = scmp.lt.s32.totalorder %s343_s15, %s343_s15 }
   0x6   : > { %p326_p4 = pneg %p397_p2 }
   0x7   : > { %p353_p12 = por %p352_p11, %p351_p10 }
   0x8   : > { %p327_p5 = pnand %p330_p3, %p326_p4 }
   0xa   : > { %p345_p7 = pneg %p327_p5 }
   0xc   : > { %p346_p8 = pnand %p345_p7, %p344_p6 }
   0xe   : > { %p347_p9 = pneg %p346_p8 }
  0x10   : > { %p354_p13 = pnand %p353_p12, %p347_p9 }
  0x12   : > { %357 = shalt.err (!%p354_p13)
}
  0x13   : > { %s370_s16 = smov [#allocation2]   ;;  %124 = sbr.rel (%p397_p2) target bundleno = 71 (0x47), region = 28 }
  0x14   : > { %329 = dma.vmem_to_smem (!%p327_p5), %s105_s13, 16, %s370_s16, [#allocation3]  }
  0x1a   : > { %363 = dma.done.wait (%p330_p3), [#allocation3], 16  }
  0x1b   : > { %365 = vsyncadd (%p330_p3), [#allocation3], 4294967280 }
  0x1c   : > { %130 = sfence }
  0x1d   : > { %p145_p0 = scmp.lt.s32.totalorder %s296_s10, 1  ;;  %s153_s17 = sld [smem:[#allocation2]]  ;;  %vm226_vm0 = vcmask 1040384   ;;  %vm228_vm1 = vcmask 1041408  }
  0x1e   : > { %s305_s18 = sld [smem:[#allocation2 + $0x1]]  ;;  %s410_s19 = sld [smem:[#allocation2 + $0x2]] }
  0x1f   : > { %s443_s10 = smov (!%p145_p0, %s296_s10), 1  ;;  %s307_s20 = sld [smem:[#allocation2 + $0x3]] }
  0x20   : > { %s308_s21 = sld [smem:[#allocation2 + $0x4]]  ;;  %s303_s22 = sshll.u32 %s443_s10, 3 }
  0x21   : > { %s310_s23 = sld [smem:[#allocation2 + $0x6]]  ;;  %s311_s24 = sld [smem:[#allocation2 + $0x7]] }
  0x22   : > { %s313_s25 = sld [smem:[#allocation2 + $0x9]]  ;;  %s314_s26 = sld [smem:[#allocation2 + $0xa]] }
  0x23   : > { %s416_s29 = scalar_lea.vmem %s439_s1, %s303_s22  ;;  %s315_s30 = sld [smem:[#allocation2 + $0xb]]  ;;  %v181_v2 = vstv %s153_s17 }
  0x24   : > { %s418_s3 = sld [smem:[#allocation2 + $0x5]]  ;;  %s420_s4 = sld [smem:[#allocation2 + $0x8]]  ;;  %v169_v0 = vld [vmem:[%s416_s29] sm:$0x1]  ;;  %v172_v1 = vld [vmem:[%s416_s29 + $0x1] sm:$0x1]  ;;  %v183_v4 = vstv %s305_s18  ;;  %v186_v5 = vstv %s410_s19 }
  0x25   : > { %v175_v3 = vld [vmem:[%s416_s29 + $0x2] sm:$0x1]  ;;  %v189_v6 = vstv %s307_s20  ;;  %s316_s5 = sld [smem:[#allocation2 + $0xc]]  ;;  %s317_s6 = sld [smem:[#allocation2 + $0xd]]  ;;  %v180_v37 = vld [vmem:[%s416_s29 + $0x5] sm:$0x1] }
  0x26   : > { %v191_v9 = vstv %s308_s21  ;;  %s318_s7 = sld [smem:[#allocation2 + $0xe]]  ;;  %s319_s8 = sld [smem:[#allocation2 + $0xf]]  ;;  %v178_v43 = vld [vmem:[%s416_s29 + $0x3] sm:$0x1]  ;;  %v179_v44 = vld [vmem:[%s416_s29 + $0x4] sm:$0x1] }
  0x27   : > { %v197_v10 = vstv %s310_s23  ;;  %v199_v14 = vstv %s311_s24  ;;  %s304_s11 = sshll.u32 %s443_s10, 2 }
  0x28   : > { %v170_v7 = vstv %s313_s25  ;;  %v173_v8 = vstv %s314_s26  ;;  %s152_s14 = scalar_lea.vmem %s440_s2, %s304_s11 }
  0x29   : > { %v171_v11 = vsub.f32 %v169_v0, %v170_v7  ;;  %v174_v12 = vsub.f32 %v172_v1, %v173_v8  ;;  %v176_v13 = vstv %s315_s30 }
  0x2a   : > { %v177_v15 = vsub.f32 %v175_v3, %v176_v13  ;;  %v194_v24 = vstv %s418_s3  ;;  %v202_v25 = vstv %s420_s4 }
  0x2b   : > { %v182_v16 = vmul.f32 %v181_v2, %v171_v11  ;;  %v184_v17 = vmul.f32 %v183_v4, %v174_v12  ;;  %v190_v18 = vmul.f32 %v189_v6, %v171_v11  ;;  %v192_v20 = vmul.f32 %v191_v9, %v174_v12 }
  0x2c   : > { %v187_v19 = vmul.f32 %v186_v5, %v177_v15  ;;  %v198_v21 = vmul.f32 %v197_v10, %v171_v11  ;;  %v200_v22 = vmul.f32 %v199_v14, %v174_v12  ;;  %v195_v28 = vmul.f32 %v194_v24, %v177_v15 }
  0x2d   : > { %v185_v23 = vadd.f32 %v184_v17, %v182_v16  ;;  %v193_v27 = vadd.f32 %v192_v20, %v190_v18  ;;  %v203_v30 = vmul.f32 %v202_v25, %v177_v15  ;;  %v207_v33 = vstv %s316_s5 }
  0x2e   : > { %v201_v29 = vadd.f32 %v200_v22, %v198_v21  ;;  %v212_v34 = vstv %s317_s6  ;;  %v210_v39 = vstv %s318_s7  ;;  %v215_v40 = vstv %s319_s8 }
  0x2f   : > { %v188_v26 = vadd.f32 %v187_v19, %v185_v23  ;;  %v196_v31 = vadd.f32 %v195_v28, %v193_v27 }
  0x30   : > { %v204_v32 = vadd.f32 %v203_v30, %v201_v29 }
  0x31   : > { %341 = vrcp.f32 %v188_v26  ;;  %v208_v35 = vmul.f32 %v207_v33, %v196_v31  ;;  %v219_v45 = vsub.f32 %v188_v26, %v180_v37 }
  0x32   : > { %v213_v36 = vmul.f32 %v212_v34, %v204_v32 }
  0x33   : > { %v224_v50 = vrot.slane %v219_v45, 6 }
  0x3b   : > { %v342_v38 = vpop.eup %341 }
  0x3c   : > { %v209_v41 = vmul.f32 %v342_v38, %v208_v35  ;;  %v214_v42 = vmul.f32 %v342_v38, %v213_v36 }
  0x3e   : > { %v211_v46 = vadd.f32 %v210_v39, %v209_v41  ;;  %v216_v47 = vadd.f32 %v215_v40, %v214_v42 }
  0x40   : > { %v217_v48 = vsub.f32 %v211_v46, %v178_v43  ;;  %v218_v49 = vsub.f32 %v216_v47, %v179_v44 }
  0x42   : > { %v221_v51 = vrot.slane %v218_v49, 7 }
  0x44   : > { %v227_v52 = vsel %vm226_vm0, %v217_v48, %v221_v51 }
  0x45   : > { %v229_v53 = vsel %vm228_vm1, %v227_v52, %v224_v50 }
  0x46   : > { %230 = vst [vmem:[%s152_s14] sm:$0x7] %v229_v53 }
  0x47 PF: > { %s13_s9 = sadd.s32 1, %s368_s9  }
  0x48   : > { %p10_p1 = scmp.ge.s32.totalorder %s13_s9, 4  }
  0x4a   :  { %12 = sbr.rel (!%p10_p1) target bundleno = 1 (0x1), region = 63 }
  0x51   :  { %250 = vsyncpa [#allocation3], 1 }
  0x52   :  { %252 = vsyncpa [#allocation3 + $0x1], 1 }

</bundles_post_ra>
